<compile_context>
chip_gen: v6e
topology: v6e:2x2x1
jax: 0.10.0
libtpu: 0.0.40
codegen_flags: <defaults>
</compile_context>

<pallas_src>
import functools
import math

import jax
import jax.numpy as jnp
import numpy as np
from jax.experimental import pallas as pl
from jax.experimental.pallas import tpu as pltpu


def _round_up(x: int, m: int) -> int:
    return ((x + m - 1) // m) * m


def _fold_factor(*widths: int) -> int:
    """Smallest f such that f*w is a multiple of 128 (TPU lane count) for every w."""
    f = 1
    for w in widths:
        f = math.lcm(f, 128 // math.gcd(128, int(w)))
    return f  # each term divides 128, so f <= 128


def _sca_kernel(x_ref, u_bd_ref, b1_ref, m_bd_ref, b2_ref, hid_ref, out_ref):
    # Cast the x tile to the MXU operand dtype on the VPU (no extra HBM traffic).
    x = x_ref[...].astype(u_bd_ref.dtype)
    # hidden (folded): x_f @ kron(I_fold, U^T) + tile(b1); f32 MXU accumulation,
    # f32 bias add on the VPU, f32 lane-dense store.
    h = jnp.dot(x, u_bd_ref[...], preferred_element_type=jnp.float32) + b1_ref[...]
    hid_ref[...] = h.astype(hid_ref.dtype)
    # output (folded, fused fc2): x_f @ kron(I_fold, U^T W^T) + tile(b1 W^T + b2).
    # Reads the same resident x tile -> no serial dependency on the first matmul.
    o = jnp.dot(x, m_bd_ref[...], preferred_element_type=jnp.float32) + b2_ref[...]
    out_ref[...] = o.astype(out_ref.dtype)


def _sca_kernel_out_only(x_ref, m_bd_ref, b2_ref, out_ref):
    x = x_ref[...].astype(m_bd_ref.dtype)
    o = jnp.dot(x, m_bd_ref[...], preferred_element_type=jnp.float32) + b2_ref[...]
    out_ref[...] = o.astype(out_ref.dtype)


@functools.partial(jax.jit,
                   static_argnames=("block_t", "compute_dtype", "return_hidden"))
def low_r_orth_forward(x, U, b1, W, b2, *, block_t=1024,
                       compute_dtype=jnp.bfloat16, return_hidden=True):
    """LowROrth forward.

    x: [T, I] (any float dtype; pass bf16 to halve the dominant HBM stream),
    U: [H, I] (fc1.weight), b1: [H] (fc1.bias), W: [O, H] (fc2.weight, orthogonal),
    b2: [O] (fc2.bias).
    Returns (hidden [T, H] f32, output [T, O] f32), or just output if
    return_hidden=False.  Note: compute_dtype=bfloat16 trades ~1e-2-level drift for
    bandwidth; pass jnp.float32 for exact parity with the PyTorch reference.
    """
    T, I = x.shape
    H = U.shape[0]
    O = W.shape[0]

    # Lane-dense fold factor: fold*I, fold*H, fold*O are all multiples of 128.
    fold = _fold_factor(I, H, O)

    # One-time wrapper prep (fused by XLA, never per grid step).
    ut = U.astype(jnp.float32).T                                    # [I, H]
    wt = W.astype(jnp.float32).T                                    # [H, O]
    m = jnp.dot(ut, wt, precision=jax.lax.Precision.HIGHEST)        # fused fc2: [I, O]
    b2_fused = jnp.dot(b1.astype(jnp.float32), wt,
                       precision=jax.lax.Precision.HIGHEST) + b2.astype(jnp.float32)
    eye = jnp.eye(fold, dtype=jnp.float32)
    u_bd = jnp.kron(eye, ut).astype(compute_dtype)                  # [f*I, f*H]
    m_bd = jnp.kron(eye, m).astype(compute_dtype)                   # [f*I, f*O]
    b1_tiled = jnp.tile(b1.astype(jnp.float32), fold)[None, :]      # [1, f*H]
    b2_tiled = jnp.tile(b2_fused, fold)[None, :]                    # [1, f*O]

    t_len = _round_up(T, fold)
    xc = x
    if t_len != T:
        # TODO(synk): only hit when T is not a multiple of `fold`; the pad (and the
        # [:T] slices below) are extra HBM copies — keep T a multiple of the fold
        # factor (16 for I=O=16, H=8) to stay on the copy-free path.
        xc = jnp.pad(xc, ((0, t_len - T), (0, 0)))
    x_f = xc.reshape(t_len // fold, fold * I)                       # free re-view

    # Time tile: as large as block_t allows, capped so the grid keeps >= 2 steps
    # (v7x megacore shards the "parallel" axis across both TensorCores), and a
    # multiple of 8*fold so folded blocks satisfy the (8, 128) rule.  The last block
    # may be ragged; Pallas masks its out-of-bounds reads/writes.
    step = 8 * fold
    if t_len <= step:
        tm = t_len
    else:
        tm = min(_round_up(block_t, step), _round_up(pl.cdiv(t_len, 2), step))
    n_blocks = pl.cdiv(t_len, tm)
    bt = tm // fold                                                 # folded rows / tile

    x_spec = pl.BlockSpec((bt, fold * I), lambda i: (i, 0))         # pipelined per step
    resident = lambda shape: pl.BlockSpec(shape, lambda i: (0, 0))  # VMEM-resident
    out_spec = pl.BlockSpec((bt, fold * O), lambda i: (i, 0))
    params = pltpu.CompilerParams(dimension_semantics=("parallel",))

    if return_hidden:
        hid_spec = pl.BlockSpec((bt, fold * H), lambda i: (i, 0))
        hid_f, out_f = pl.pallas_call(
            _sca_kernel,
            out_shape=(jax.ShapeDtypeStruct((t_len // fold, fold * H), jnp.float32),
                       jax.ShapeDtypeStruct((t_len // fold, fold * O), jnp.float32)),
            grid=(n_blocks,),
            in_specs=[x_spec,
                      resident((fold * I, fold * H)), resident((1, fold * H)),
                      resident((fold * I, fold * O)), resident((1, fold * O))],
            out_specs=(hid_spec, out_spec),
            compiler_params=params,
        )(x_f, u_bd, b1_tiled, m_bd, b2_tiled)
        hidden = hid_f.reshape(t_len, H)                            # free re-view
        output = out_f.reshape(t_len, O)
        if t_len != T:
            hidden, output = hidden[:T], output[:T]
        return hidden, output

    out_f = pl.pallas_call(
        _sca_kernel_out_only,
        out_shape=jax.ShapeDtypeStruct((t_len // fold, fold * O), jnp.float32),
        grid=(n_blocks,),
        in_specs=[x_spec, resident((fold * I, fold * O)), resident((1, fold * O))],
        out_specs=out_spec,
        compiler_params=params,
    )(x_f, m_bd, b2_tiled)
    output = out_f.reshape(t_len, O)
    if t_len != T:
        output = output[:T]
    return output


if __name__ == "__main__":
    # x is [n_time, input_size]; input_size == output_size so the
    # fc1.bias = -U_init @ b_init branch of __init__ is exercised.
    # n_time is a multiple of the fold (16) -> no pad/slice fallback, but NOT a
    # multiple of the auto-chosen time tile -> exercises the ragged last grid block.
    n_time = 320
    input_size = 16
    output_size = 16
    hidden_size = 8

    key = jax.random.PRNGKey(0)
    k_x, k_u, k_b, k_w = jax.random.split(key, 4)

    x = jax.random.normal(k_x, (n_time, input_size), dtype=jnp.float32)

    # Deterministic parameter init mirroring __init__:
    U_init = jax.random.normal(k_u, (hidden_size, input_size), dtype=jnp.float32) * 0.1
    b_init = jax.random.normal(k_b, (output_size,), dtype=jnp.float32) * 0.1

    fc1_weight = U_init                       # [H, I]
    fc1_bias = -U_init @ b_init               # [H]  (input_size == output_size branch)

    # TODO(synk): geotorch.orthogonal is a training-time parametrization; the forward
    # only needs an orthogonal weight, stood in deterministically via QR.
    A = jax.random.normal(k_w, (output_size, hidden_size), dtype=jnp.float32)
    Q, _ = jnp.linalg.qr(A)
    fc2_weight = Q                            # [O, H], orthonormal columns
    fc2_bias = b_init                         # [O]

    # Pure-numpy f32 reference (exactly the PyTorch chained forward).
    x_np = np.asarray(x)
    hidden_ref = x_np @ np.asarray(fc1_weight).T + np.asarray(fc1_bias)
    output_ref = hidden_ref @ np.asarray(fc2_weight).T + np.asarray(fc2_bias)

    # 1) float32 compute path (parity path; in practice matches to ~1e-6 — the assert
    #    tolerance is kept robust to MXU f32-emulation pass-count defaults).
    hid32, out32 = low_r_orth_forward(x, fc1_weight, fc1_bias, fc2_weight, fc2_bias,
                                      compute_dtype=jnp.float32)
    jax.block_until_ready((hid32, out32))
    assert hid32.shape == (n_time, hidden_size)
    assert out32.shape == (n_time, output_size)
    assert np.allclose(hid32, hidden_ref, atol=2e-2, rtol=2e-2)
    assert np.allclose(out32, output_ref, atol=2e-2, rtol=2e-2)

    # 2) default bfloat16 MXU-operand path (bandwidth path; bf16-level drift expected).
    hid16, out16 = low_r_orth_forward(x, fc1_weight, fc1_bias, fc2_weight, fc2_bias)
    jax.block_until_ready((hid16, out16))
    assert np.allclose(hid16, hidden_ref, atol=1e-1, rtol=1e-1)
    assert np.allclose(out16, output_ref, atol=1e-1, rtol=1e-1)

    # 3) output-only path fed a bf16 input stream (halved x DMA, no hidden write-back).
    out_only = low_r_orth_forward(x.astype(jnp.bfloat16), fc1_weight, fc1_bias,
                                  fc2_weight, fc2_bias, return_hidden=False)
    out_only = jax.block_until_ready(out_only)
    assert out_only.shape == (n_time, output_size)
    assert np.allclose(out_only, output_ref, atol=1e-1, rtol=1e-1)

    print("KERNEL_OK")
</pallas_src>

<mosaic_0001>
module attributes {stable_mosaic.version = 11 : i64} {
  func.func @_sca_kernel(%arg0: i32, %arg1: memref<16x256xf32, #tpu.memory_space<vmem>>, %arg2: memref<256x128xf32, #tpu.memory_space<vmem>>, %arg3: memref<1x128xf32, #tpu.memory_space<vmem>>, %arg4: memref<256x256xf32, #tpu.memory_space<vmem>>, %arg5: memref<1x256xf32, #tpu.memory_space<vmem>>, %arg6: memref<16x128xf32, #tpu.memory_space<vmem>>, %arg7: memref<16x256xf32, #tpu.memory_space<vmem>>) attributes {dimension_semantics = [#tpu.dimension_semantics<parallel>], iteration_bounds = array<i64: 2>, scalar_prefetch = 0 : i64, scratch_operands = 0 : i64, tpu.core_type = #tpu.core_type<tc>, window_params = [{transform_indices = @transform_0, window_bounds = array<i64: 16, 256>}, {pipeline_mode = #tpu.pipeline_mode<synchronous>, transform_indices = @transform_1, window_bounds = array<i64: 256, 128>}, {pipeline_mode = #tpu.pipeline_mode<synchronous>, transform_indices = @transform_2, window_bounds = array<i64: 1, 128>}, {pipeline_mode = #tpu.pipeline_mode<synchronous>, transform_indices = @transform_3, window_bounds = array<i64: 256, 256>}, {pipeline_mode = #tpu.pipeline_mode<synchronous>, transform_indices = @transform_4, window_bounds = array<i64: 1, 256>}, {transform_indices = @transform_5, window_bounds = array<i64: 16, 128>}, {transform_indices = @transform_6, window_bounds = array<i64: 16, 256>}]} {
    %c0 = arith.constant 0 : index
    %c0_0 = arith.constant 0 : index
    %0 = vector.load %arg1[%c0, %c0_0] : memref<16x256xf32, #tpu.memory_space<vmem>>, vector<16x256xf32>
    %c0_1 = arith.constant 0 : index
    %c0_2 = arith.constant 0 : index
    %1 = vector.load %arg2[%c0_1, %c0_2] : memref<256x128xf32, #tpu.memory_space<vmem>>, vector<256x128xf32>
    %cst = arith.constant dense<0.000000e+00> : vector<16x128xf32>
    %2 = tpu.matmul %0, %1, %cst {dimension_numbers = #tpu.dot_dimension_numbers<[1], [0], [0], [1], [0, 0, 1, 1], [], []>} : vector<16x256xf32>, vector<256x128xf32>, vector<16x128xf32> -> vector<16x128xf32>
    %c0_3 = arith.constant 0 : index
    %c0_4 = arith.constant 0 : index
    %3 = vector.load %arg3[%c0_3, %c0_4] : memref<1x128xf32, #tpu.memory_space<vmem>>, vector<1x128xf32>
    %4 = vector.broadcast %3 : vector<1x128xf32> to vector<16x128xf32>
    %5 = arith.addf %2, %4 : vector<16x128xf32>
    %c0_5 = arith.constant 0 : index
    %c0_6 = arith.constant 0 : index
    %6 = vector.load %arg6[%c0_5, %c0_6] : memref<16x128xf32, #tpu.memory_space<vmem>>, vector<16x128xf32>
    tpu.vector_store %arg6[%c0_5, %c0_6], %5 {strides = array<i32>} : memref<16x128xf32, #tpu.memory_space<vmem>>, vector<16x128xf32>,
    %c0_7 = arith.constant 0 : index
    %c0_8 = arith.constant 0 : index
    %7 = vector.load %arg4[%c0_7, %c0_8] : memref<256x256xf32, #tpu.memory_space<vmem>>, vector<256x256xf32>
    %cst_9 = arith.constant dense<0.000000e+00> : vector<16x256xf32>
    %8 = tpu.matmul %0, %7, %cst_9 {dimension_numbers = #tpu.dot_dimension_numbers<[1], [0], [0], [1], [0, 0, 1, 1], [], []>} : vector<16x256xf32>, vector<256x256xf32>, vector<16x256xf32> -> vector<16x256xf32>
    %c0_10 = arith.constant 0 : index
    %c0_11 = arith.constant 0 : index
    %9 = vector.load %arg5[%c0_10, %c0_11] : memref<1x256xf32, #tpu.memory_space<vmem>>, vector<1x256xf32>
    %10 = vector.broadcast %9 : vector<1x256xf32> to vector<16x256xf32>
    %11 = arith.addf %8, %10 : vector<16x256xf32>
    %c0_12 = arith.constant 0 : index
    %c0_13 = arith.constant 0 : index
    %12 = vector.load %arg7[%c0_12, %c0_13] : memref<16x256xf32, #tpu.memory_space<vmem>>, vector<16x256xf32>
    tpu.vector_store %arg7[%c0_12, %c0_13], %11 {strides = array<i32>} : memref<16x256xf32, #tpu.memory_space<vmem>>, vector<16x256xf32>,
    return
  }
  func.func @transform_0(%arg0: i32) -> (i32, i32) {
    %c0_i32 = arith.constant 0 : i32
    %c0_i32_0 = arith.constant 0 : i32
    return %arg0, %c0_i32 : i32, i32
  }
  func.func @transform_1(%arg0: i32) -> (i32, i32) {
    %c0_i32 = arith.constant 0 : i32
    %c0_i32_0 = arith.constant 0 : i32
    %c0_i32_1 = arith.constant 0 : i32
    return %c0_i32, %c0_i32_0 : i32, i32
  }
  func.func @transform_2(%arg0: i32) -> (i32, i32) {
    %c0_i32 = arith.constant 0 : i32
    %c0_i32_0 = arith.constant 0 : i32
    %c0_i32_1 = arith.constant 0 : i32
    return %c0_i32, %c0_i32_0 : i32, i32
  }
  func.func @transform_3(%arg0: i32) -> (i32, i32) {
    %c0_i32 = arith.constant 0 : i32
    %c0_i32_0 = arith.constant 0 : i32
    %c0_i32_1 = arith.constant 0 : i32
    return %c0_i32, %c0_i32_0 : i32, i32
  }
  func.func @transform_4(%arg0: i32) -> (i32, i32) {
    %c0_i32 = arith.constant 0 : i32
    %c0_i32_0 = arith.constant 0 : i32
    %c0_i32_1 = arith.constant 0 : i32
    return %c0_i32, %c0_i32_0 : i32, i32
  }
  func.func @transform_5(%arg0: i32) -> (i32, i32) {
    %c0_i32 = arith.constant 0 : i32
    %c0_i32_0 = arith.constant 0 : i32
    return %arg0, %c0_i32 : i32, i32
  }
  func.func @transform_6(%arg0: i32) -> (i32, i32) {
    %c0_i32 = arith.constant 0 : i32
    %c0_i32_0 = arith.constant 0 : i32
    return %arg0, %c0_i32 : i32, i32
  }
}

</mosaic_0001>

<bundles_post_ra>
// kernel: tile.18
= control target key start
LH: loop header
LB: loop body
LE: loop exit
PB: predicated region body
PF: predicated region fallthrough
CT: control target
= control target key end

     0   :  { %s28_s0 = inlined_call_operand.vmem [shape: f32[16], index: 0, kind: input, shape index: {}]   ;;  %s29_s1 = inlined_call_operand.vmem [shape: f32[16,16], index: 1, kind: output, shape index: {}]  }
   0x1   :  { %v4_v0 = vld [vmem:[%s28_s0] ss:$0 sm:$0xff] }
   0x2   :  { %5 = vst [vmem:[%s29_s1] sm:$0xff] %v4_v0  ;;  %8 = vst [vmem:[%s29_s1 + $0x8] sm:$0xff] %v4_v0 }

// kernel: tile.19
= control target key start
LH: loop header
LB: loop body
LE: loop exit
PB: predicated region body
PF: predicated region fallthrough
CT: control target
= control target key end

     0   :  { %s7_s6 = smov 3  ;;  %s21_s9 = smov 3  ;;  %vm4_vm0 = vcmask 130048   ;;  %vm11_vm1 = vcmask 1048448   ;;  %vm18_vm2 = vcmask 917248   ;;  %vm25_vm3 = vcmask 786048   ;;  %s131_s0 = inlined_call_operand.vmem [shape: f32[16,16], index: 0, kind: input, shape index: {}]   ;;  %s132_s1 = inlined_call_operand.vmem [shape: f32[1,256], index: 1, kind: output, shape index: {}]  }
   0x1   :  { %v69_v0 = vld [vmem:[%s131_s0 + $0x7] ss:$8 sm:%s7_s6]   ;;  %s84_s10 = smov 112   ;;  %v71_v1 = vld [vmem:[%s131_s0 + $0x5] ss:$8 sm:%s21_s9]   ;;  %s14_s13 = smov 3 }
   0x2   :  { %9 = vrot.lane.b32.xlu0 %v69_v0, %s84_s10  ;;  %s85_s14 = smov 80   ;;  %v70_v2 = vld [vmem:[%s131_s0 + $0x6] ss:$8 sm:%s14_s13]   ;;  %s28_s17 = smov 3  ;;  %vm32_vm4 = vcmask 654848   ;;  %vm39_vm5 = vcmask 523648  }
   0x3   :  { %23 = vrot.lane.b32.xlu1 %v71_v1, %s85_s14  ;;  %v72_v3 = vld [vmem:[%s131_s0 + $0x4] ss:$8 sm:%s28_s17]   ;;  %s35_s20 = smov 3  ;;  %s42_s21 = smov 3  ;;  %vm46_vm6 = vcmask 392448   ;;  %vm53_vm7 = vcmask 261248  }
   0x4   :  { %s86_s22 = smov 96   ;;  %s87_s23 = smov 64   ;;  %v73_v4 = vld [vmem:[%s131_s0 + $0x3] ss:$8 sm:%s35_s20]   ;;  %v74_v5 = vld [vmem:[%s131_s0 + $0x2] ss:$8 sm:%s42_s21]  }
   0x5   :  { %s2_s26 = smov 3  ;;  %s49_s29 = smov 3 }
   0x6   :  { %16 = vrot.lane.b32.xlu0 %v70_v2, %s86_s22  ;;  %v3_v6 = vld [vmem:[%s131_s0] ss:$8 sm:%s2_s26]   ;;  %s88_s3 = smov 48   ;;  %s89_s4 = smov 32  }
   0x7   :  { %30 = vrot.lane.b32.xlu1 %v72_v3, %s87_s23  ;;  %5 = vst.msk [vmem:[#allocation0] ss:$8 sm:$0x3] %vm4_vm0, %v3_v6   ;;  %v75_v7 = vld [vmem:[%s131_s0 + $0x1] ss:$8 sm:%s49_s29]   ;;  %s90_s0 = smov 16  }
   0xa   :  { %37 = vrot.lane.b32.xlu0 %v73_v4, %s88_s3 }
   0xb   :  { %44 = vrot.lane.b32.xlu1 %v74_v5, %s89_s4 }
   0xe   :  { %51 = vrot.lane.b32.xlu0 %v75_v7, %s90_s0 }
  0x74   :  { %v10_v8 = vpop.permute.xlu0 %9  }
  0x75   :  { %12 = vst.msk [vmem:[#allocation0] ss:$8 sm:$0x3] %vm11_vm1, %v10_v8   ;;  %v24_v9 = vpop.permute.xlu1 %23  }
  0x78   :  { %v17_v10 = vpop.permute.xlu0 %16  }
  0x79   :  { %19 = vst.msk [vmem:[#allocation0] ss:$8 sm:$0x3] %vm18_vm2, %v17_v10   ;;  %v31_v11 = vpop.permute.xlu1 %30  }
  0x7a   :  { %26 = vst.msk [vmem:[#allocation0] ss:$8 sm:$0x3] %vm25_vm3, %v24_v9  }
  0x7b   :  { %33 = vst.msk [vmem:[#allocation0] ss:$8 sm:$0x3] %vm32_vm4, %v31_v11  }
  0x7c   :  { %v38_v12 = vpop.permute.xlu0 %37  }
  0x7d   :  { %40 = vst.msk [vmem:[#allocation0] ss:$8 sm:$0x3] %vm39_vm5, %v38_v12   ;;  %v45_v13 = vpop.permute.xlu1 %44  }
  0x7e   :  { %47 = vst.msk [vmem:[#allocation0] ss:$8 sm:$0x3] %vm46_vm6, %v45_v13  }
  0x80   :  { %v52_v14 = vpop.permute.xlu0 %51  }
  0x81   :  { %54 = vst.msk [vmem:[#allocation0] ss:$8 sm:$0x3] %vm53_vm7, %v52_v14  }
  0x88   :  { %v59_v15 = vld [vmem:[#allocation0] sm:$0x1]  ;;  %v64_v16 = vld [vmem:[#allocation0 + $0x8] sm:$0x1] }
  0x89   :  { %62 = vst [vmem:[%s132_s1] sm:$0x1] %v59_v15  ;;  %76 = vst [vmem:[%s132_s1 + $0x1] sm:$0x1] %v64_v16 }

// kernel: tile.13.clone
= control target key start
LH: loop header
LB: loop body
LE: loop exit
PB: predicated region body
PF: predicated region fallthrough
CT: control target
= control target key end

     0   :  { %s28_s0 = inlined_call_operand.vmem [shape: f32[8], index: 0, kind: input, shape index: {}]   ;;  %s29_s1 = inlined_call_operand.vmem [shape: f32[16,8], index: 1, kind: output, shape index: {}]  }
   0x1   :  { %v4_v0 = vld [vmem:[%s28_s0] ss:$0 sm:$0xff] }
   0x2   :  { %5 = vst [vmem:[%s29_s1] sm:$0xff] %v4_v0  ;;  %8 = vst [vmem:[%s29_s1 + $0x8] sm:$0xff] %v4_v0 }

// kernel: tile.14
= control target key start
LH: loop header
LB: loop body
LE: loop exit
PB: predicated region body
PF: predicated region fallthrough
CT: control target
= control target key end

     0   :  { %s133_s10 = smov 120   ;;  %s134_s11 = smov 104   ;;  %vm3_vm0 = vcmask 64512   ;;  %vm9_vm1 = vcmask 1048512   ;;  %vm15_vm2 = vcmask 982912   ;;  %vm21_vm3 = vcmask 917312   ;;  %s209_s0 = inlined_call_operand.vmem [shape: f32[16,8], index: 0, kind: input, shape index: {}]   ;;  %s210_s1 = inlined_call_operand.vmem [shape: f32[1,128], index: 1, kind: output, shape index: {}]  }
   0x1   :  { %v103_v0 = vld [vmem:[%s209_s0 + $0xf] sm:$0x1]   ;;  %v105_v1 = vld [vmem:[%s209_s0 + $0xd] sm:$0x1]   ;;  %v104_v2 = vld [vmem:[%s209_s0 + $0xe] sm:$0x1]  }
   0x2   :  { %7 = vrot.lane.b32.xlu0 %v103_v0, %s133_s10  ;;  %19 = vrot.lane.b32.xlu1 %v105_v1, %s134_s11  ;;  %v106_v3 = vld [vmem:[%s209_s0 + $0xc] sm:$0x1]   ;;  %s135_s16 = smov 112   ;;  %s136_s17 = smov 96   ;;  %v107_v4 = vld [vmem:[%s209_s0 + $0xb] sm:$0x1]  }
   0x3   :  { %v108_v5 = vld [vmem:[%s209_s0 + $0xa] sm:$0x1]   ;;  %v2_v6 = vld [vmem:[%s209_s0] sm:$0x1]   ;;  %s137_s24 = smov 88   ;;  %s138_s25 = smov 80  }
   0x4   :  { %4 = vst.msk [vmem:[#allocation0] sm:$0x1] %vm3_vm0, %v2_v6   ;;  %v109_v7 = vld [vmem:[%s209_s0 + $0x9] sm:$0x1]   ;;  %v110_v8 = vld [vmem:[%s209_s0 + $0x8] sm:$0x1]  }
   0x5   :  { %s139_s30 = smov 72   ;;  %s140_s2 = smov 64   ;;  %v111_v9 = vld [vmem:[%s209_s0 + $0x7] sm:$0x1]   ;;  %v112_v10 = vld [vmem:[%s209_s0 + $0x6] sm:$0x1]  }
   0x6   :  { %13 = vrot.lane.b32.xlu0 %v104_v2, %s135_s16  ;;  %25 = vrot.lane.b32.xlu1 %v106_v3, %s136_s17  ;;  %s141_s7 = smov 56   ;;  %s142_s8 = smov 48   ;;  %v113_v11 = vld [vmem:[%s209_s0 + $0x5] sm:$0x1]   ;;  %v114_v12 = vld [vmem:[%s209_s0 + $0x4] sm:$0x1]  }
   0x7   :  { %s143_s13 = smov 40   ;;  %s144_s14 = smov 32   ;;  %v115_v13 = vld [vmem:[%s209_s0 + $0x3] sm:$0x1]   ;;  %v116_v14 = vld [vmem:[%s209_s0 + $0x2] sm:$0x1]  }
   0x8   :  { %s145_s19 = smov 24   ;;  %s146_s20 = smov 16   ;;  %v117_v15 = vld [vmem:[%s209_s0 + $0x1] sm:$0x1]   ;;  %vm27_vm4 = vcmask 851712   ;;  %vm33_vm5 = vcmask 786112  }
   0x9   :  { %s147_s0 = smov 8   ;;  %vm39_vm6 = vcmask 720512   ;;  %vm45_vm7 = vcmask 654912   ;;  %vm51_vm8 = vcmask 589312   ;;  %vm57_vm9 = vcmask 523712  }
   0xa   :  { %31 = vrot.lane.b32.xlu0 %v107_v4, %s137_s24  ;;  %37 = vrot.lane.b32.xlu1 %v108_v5, %s138_s25  ;;  %vm63_vm10 = vcmask 458112   ;;  %vm69_vm11 = vcmask 392512   ;;  %vm75_vm12 = vcmask 326912   ;;  %vm81_vm13 = vcmask 261312  }
   0xb   :  { %vm87_vm14 = vcmask 195712   ;;  %vm93_vm15 = vcmask 130112  }
   0xe   :  { %43 = vrot.lane.b32.xlu0 %v109_v7, %s139_s30  ;;  %49 = vrot.lane.b32.xlu1 %v110_v8, %s140_s2 }
  0x12   :  { %55 = vrot.lane.b32.xlu0 %v111_v9, %s141_s7  ;;  %61 = vrot.lane.b32.xlu1 %v112_v10, %s142_s8 }
  0x16   :  { %67 = vrot.lane.b32.xlu0 %v113_v11, %s143_s13  ;;  %73 = vrot.lane.b32.xlu1 %v114_v12, %s144_s14 }
  0x1a   :  { %79 = vrot.lane.b32.xlu0 %v115_v13, %s145_s19  ;;  %85 = vrot.lane.b32.xlu1 %v116_v14, %s146_s20 }
  0x1e   :  { %91 = vrot.lane.b32.xlu0 %v117_v15, %s147_s0 }
  0x74   :  { %v8_v16 = vpop.permute.xlu0 %7   ;;  %v20_v17 = vpop.permute.xlu1 %19  }
  0x75   :  { %10 = vst.msk [vmem:[#allocation0] sm:$0x1] %vm9_vm1, %v8_v16  }
  0x78   :  { %v14_v18 = vpop.permute.xlu0 %13   ;;  %v26_v19 = vpop.permute.xlu1 %25  }
  0x79   :  { %16 = vst.msk [vmem:[#allocation0] sm:$0x1] %vm15_vm2, %v14_v18  }
  0x7a   :  { %22 = vst.msk [vmem:[#allocation0] sm:$0x1] %vm21_vm3, %v20_v17  }
  0x7b   :  { %28 = vst.msk [vmem:[#allocation0] sm:$0x1] %vm27_vm4, %v26_v19  }
  0x7c   :  { %v32_v20 = vpop.permute.xlu0 %31   ;;  %v38_v21 = vpop.permute.xlu1 %37  }
  0x7d   :  { %34 = vst.msk [vmem:[#allocation0] sm:$0x1] %vm33_vm5, %v32_v20  }
  0x7e   :  { %40 = vst.msk [vmem:[#allocation0] sm:$0x1] %vm39_vm6, %v38_v21  }
  0x80   :  { %v44_v22 = vpop.permute.xlu0 %43   ;;  %v50_v23 = vpop.permute.xlu1 %49  }
  0x81   :  { %46 = vst.msk [vmem:[#allocation0] sm:$0x1] %vm45_vm7, %v44_v22  }
  0x82   :  { %52 = vst.msk [vmem:[#allocation0] sm:$0x1] %vm51_vm8, %v50_v23  }
  0x84   :  { %v56_v24 = vpop.permute.xlu0 %55   ;;  %v62_v25 = vpop.permute.xlu1 %61  }
  0x85   :  { %58 = vst.msk [vmem:[#allocation0] sm:$0x1] %vm57_vm9, %v56_v24  }
  0x86   :  { %64 = vst.msk [vmem:[#allocation0] sm:$0x1] %vm63_vm10, %v62_v25  }
  0x88   :  { %v68_v26 = vpop.permute.xlu0 %67   ;;  %v74_v27 = vpop.permute.xlu1 %73  }
  0x89   :  { %70 = vst.msk [vmem:[#allocation0] sm:$0x1] %vm69_vm11, %v68_v26  }
  0x8a   :  { %76 = vst.msk [vmem:[#allocation0] sm:$0x1] %vm75_vm12, %v74_v27  }
  0x8c   :  { %v80_v28 = vpop.permute.xlu0 %79   ;;  %v86_v29 = vpop.permute.xlu1 %85  }
  0x8d   :  { %82 = vst.msk [vmem:[#allocation0] sm:$0x1] %vm81_vm13, %v80_v28  }
  0x8e   :  { %88 = vst.msk [vmem:[#allocation0] sm:$0x1] %vm87_vm14, %v86_v29  }
  0x90   :  { %v92_v30 = vpop.permute.xlu0 %91  }
  0x91   :  { %94 = vst.msk [vmem:[#allocation0] sm:$0x1] %vm93_vm15, %v92_v30  }
  0x98   :  { %v99_v31 = vld [vmem:[#allocation0] sm:$0x1] }
  0x99   :  { %102 = vst [vmem:[%s210_s1] sm:$0x1] %v99_v31 }

// kernel: low_r_orth_forward.1
= control target key start
LH: loop header
LB: loop body
LE: loop exit
PB: predicated region body
PF: predicated region fallthrough
CT: control target
= control target key end

     0   :  { %s1362_s21 = smov 0   ;;  %s1364_s22 = smov 0   ;;  %s1800_s0 = inlined_call_operand.vmem [shape: f32[20,256], index: 0, kind: input, shape index: {}]   ;;  %s1801_s1 = inlined_call_operand.vmem [shape: f32[256,128], index: 1, kind: input, shape index: {}]   ;;  %s1802_s2 = inlined_call_operand.vmem [shape: f32[1,128], index: 2, kind: input, shape index: {}]   ;;  %s1803_s3 = inlined_call_operand.vmem [shape: f32[256,256], index: 3, kind: input, shape index: {}]   ;;  %s1804_s4 = inlined_call_operand.vmem [shape: f32[1,256], index: 4, kind: input, shape index: {}]   ;;  %s1805_s5 = inlined_call_operand.vmem [shape: f32[20,128], index: 5, kind: output, shape index: {0}]   ;;  %s1806_s6 = inlined_call_operand.vmem [shape: f32[20,256], index: 6, kind: output, shape index: {1}]  }
   0x1   :  { %s1366_s23 = smov 0  }
   0x2 LB: > { %s1375_s24 = sadd.s32 4294967295, %s1261_s23   ;;  %s1377_s25 = sadd.s32 1, %s1261_s23   ;;  %s1261_s23 = sphi %s1366_s23, %s1813_s23   ;;  %s1257_s22 = sphi %s1364_s22, %s1812_s22   ;;  %s1253_s21 = sphi %s1362_s21, %s1811_s21  }
   0x3   : > { %s131_s26 = ssub.s32 %s1261_s23, %s1377_s25  ;;  %s134_s27 = sadd.s32 1, %s1257_s22 }
   0x4   : > { %p132_p0 = scmp.eq.s32.totalorder %s131_s26, 0  ;;  %p144_p1 = scmp.ne.s32.totalorder %s1257_s22, %s1253_s21 }
   0x5   : > { %p145_p2 = scmp.eq.s32.totalorder %s1375_s24, 1  ;;  %p935_p3 = scmp.ge.s32.totalorder %s1261_s23, 1 }
   0x6   : > { %s1385_s28 = scalar_select %p132_p0, %s1257_s22, %s134_s27  }
   0x7   : > { %p1387_p4 = por %p145_p2, %p144_p1  ;;  %p227_p5 = scmp.lt.s32.totalorder %s1261_s23, 3 }
   0x9   : > { %p228_p6 = pnand %p935_p3, %p227_p5 }
   0xa   : > { %s1515_s16 = sshll.u32 (!%p228_p6), %s1375_s24, 1  ;;  %s257_s15 = sand.u32 (!%p228_p6), 1, %s1253_s21  }
   0xb   : > { %231 = sbr.rel (%p228_p6) target bundleno = 366 (0x16e), region = 40  ;;  %p272_p7 = scmp.lt.s32.totalorder (!%p228_p6), %s1515_s16, 2 }
   0xc   : > { %s936_s17 = sshll.u32 (!%p228_p6), %s257_s15, 4 }
  0x10   : > { %v445_v0 = vld [vmem:[%s1803_s3 + $0xf8] sm:$0xff]  ;;  %v444_v1 = vld [vmem:[%s1803_s3 + $0xf0] sm:$0xff]  ;;  %v443_v2 = vld [vmem:[%s1803_s3 + $0xe8] sm:$0xff]  ;;  %s1563_s10 = scalar_select %p272_p7, %s1515_s16, 2 }
  0x11   : > { %490 = vmatprep.subr.mxu1 %v445_v0  ;;  %v442_v3 = vld [vmem:[%s1803_s3 + $0xe0] sm:$0xff]  ;;  %v441_v4 = vld [vmem:[%s1803_s3 + $0xd8] sm:$0xff]  ;;  %v440_v5 = vld [vmem:[%s1803_s3 + $0xd0] sm:$0xff]  ;;  %s583_s23 = ssub.s32 (%p1387_p4), 3, %s1515_s16  ;;  %s977_s26 = sshll.u32 (%p1387_p4), %s1375_s24, 4 }
  0x12   : > { %491 = vmatpush1.msra.mxu1 %v444_v1  ;;  %v439_v6 = vld [vmem:[%s1803_s3 + $0xc8] sm:$0xff]  ;;  %v438_v7 = vld [vmem:[%s1803_s3 + $0xc0] sm:$0xff]  ;;  %v437_v8 = vld [vmem:[%s1803_s3 + $0xb8] sm:$0xff]  ;;  %s976_s11 = sshll.u32 %s1563_s10, 4  ;;  %s937_s10 = sshll.u32 %s257_s15, 5 }
  0x13   : > { %492 = vmatprep.subr.mxu1 %v443_v2  ;;  %v436_v9 = vld [vmem:[%s1803_s3 + $0xb0] sm:$0xff]  ;;  %v435_v10 = vld [vmem:[%s1803_s3 + $0xa8] sm:$0xff]  ;;  %v434_v11 = vld [vmem:[%s1803_s3 + $0xa0] sm:$0xff]  ;;  %s276_s8 = scalar_lea.vmem %s1800_s0, %s976_s11  ;;  %s1696_s11 = scalar_lea.vmem [#allocation2], %s936_s17  }
  0x14   : > { %493 = vmatpush1.msra.mxu1 %v442_v3  ;;  %v329_v12 = vld [vmem:[%s1801_s1 + $0xf8] sm:$0xff]  ;;  %v328_v15 = vld [vmem:[%s1801_s1 + $0xf0] sm:$0xff]  ;;  %v431_v18 = vld [vmem:[%s1803_s3 + $0x88] sm:$0xff]  ;;  %p584_p8 = scmp.lt.s32.totalorder (%p1387_p4), %s583_s23, 2  ;;  %s1716_s7 = scalar_lea.vmem (%p1387_p4), %s1805_s5, %s977_s26  }
  0x15   : > { %494 = vmatprep.subr.mxu1 %v441_v4  ;;  %v433_v13 = vld [vmem:[%s1803_s3 + $0x98] sm:$0xff]  ;;  %985 = vmatprep.subr.mxu0 %v329_v12  ;;  %v432_v16 = vld [vmem:[%s1803_s3 + $0x90] sm:$0xff]  ;;  %v327_v19 = vld [vmem:[%s1801_s1 + $0xe8] sm:$0xff] }
  0x16   : > { %495 = vmatpush1.msra.mxu1 %v440_v5  ;;  %v313_v14 = vld [vmem:[%s1801_s1 + $0x78] sm:$0xff]  ;;  %v312_v17 = vld [vmem:[%s1801_s1 + $0x70] sm:$0xff]  ;;  %v311_v20 = vld [vmem:[%s1801_s1 + $0x68] sm:$0xff] }
  0x17   : > { %496 = vmatprep.subr.mxu1 %v439_v6  ;;  %986 = vmatpush3.msra.mxu0 %v313_v14  ;;  %v430_v21 = vld [vmem:[%s1803_s3 + $0x80] sm:$0xff]  ;;  %v429_v23 = vld [vmem:[%s1803_s3 + $0x78] sm:$0xff]  ;;  %v428_v25 = vld [vmem:[%s1803_s3 + $0x70] sm:$0xff] }
  0x18   : > { %497 = vmatpush1.msra.mxu1 %v438_v7  ;;  %987 = vmatprep.subr.mxu0 %v328_v15  ;;  %v326_v22 = vld [vmem:[%s1801_s1 + $0xe0] sm:$0xff]  ;;  %v325_v26 = vld [vmem:[%s1801_s1 + $0xd8] sm:$0xff]  ;;  %v427_v27 = vld [vmem:[%s1803_s3 + $0x68] sm:$0xff] }
  0x19   : > { %498 = vmatprep.subr.mxu1 %v437_v8  ;;  %988 = vmatpush3.msra.mxu0 %v312_v17  ;;  %v310_v24 = vld [vmem:[%s1801_s1 + $0x60] sm:$0xff]  ;;  %v309_v28 = vld [vmem:[%s1801_s1 + $0x58] sm:$0xff]  ;;  %v324_v30 = vld [vmem:[%s1801_s1 + $0xd0] sm:$0xff] }
  0x1a   : > { %499 = vmatpush1.msra.mxu1 %v436_v9  ;;  %989 = vmatprep.subr.mxu0 %v327_v19  ;;  %v426_v29 = vld [vmem:[%s1803_s3 + $0x60] sm:$0xff]  ;;  %v425_v31 = vld [vmem:[%s1803_s3 + $0x58] sm:$0xff]  ;;  %v308_v32 = vld [vmem:[%s1801_s1 + $0x50] sm:$0xff] }
  0x1b   : > { %500 = vmatprep.subr.mxu1 %v435_v10  ;;  %990 = vmatpush3.msra.mxu0 %v311_v20  ;;  %v424_v33 = vld [vmem:[%s1803_s3 + $0x50] sm:$0xff]  ;;  %v323_v34 = vld [vmem:[%s1801_s1 + $0xc8] sm:$0xff]  ;;  %v422_v37 = vld [vmem:[%s1803_s3 + $0x40] sm:$0xff] }
  0x1c   : > { %501 = vmatpush1.msra.mxu1 %v434_v11  ;;  %991 = vmatprep.subr.mxu0 %v326_v22  ;;  %v423_v35 = vld [vmem:[%s1803_s3 + $0x48] sm:$0xff]  ;;  %v322_v38 = vld [vmem:[%s1801_s1 + $0xc0] sm:$0xff]  ;;  %v421_v39 = vld [vmem:[%s1803_s3 + $0x38] sm:$0xff] }
  0x1d   : > { %502 = vmatprep.subr.mxu1 %v433_v13  ;;  %992 = vmatpush3.msra.mxu0 %v310_v24  ;;  %v307_v36 = vld [vmem:[%s1801_s1 + $0x48] sm:$0xff]  ;;  %v306_v40 = vld [vmem:[%s1801_s1 + $0x40] sm:$0xff]  ;;  %v420_v41 = vld [vmem:[%s1803_s3 + $0x30] sm:$0xff] }
  0x1e   : > { %503 = vmatpush1.msra.mxu1 %v432_v16  ;;  %993 = vmatprep.subr.mxu0 %v325_v26  ;;  %v321_v42 = vld [vmem:[%s1801_s1 + $0xb8] sm:$0xff]  ;;  %v419_v43 = vld [vmem:[%s1803_s3 + $0x28] sm:$0xff]  ;;  %v418_v45 = vld [vmem:[%s1803_s3 + $0x20] sm:$0xff] }
  0x1f   : > { %504 = vmatprep.subr.mxu1 %v431_v18  ;;  %994 = vmatpush3.msra.mxu0 %v309_v28  ;;  %v305_v44 = vld [vmem:[%s1801_s1 + $0x38] sm:$0xff]  ;;  %v320_v46 = vld [vmem:[%s1801_s1 + $0xb0] sm:$0xff]  ;;  %v319_v50 = vld [vmem:[%s1801_s1 + $0xa8] sm:$0xff] }
  0x20   : > { %505 = vmatpush1.msra.mxu1 %v430_v21  ;;  %995 = vmatprep.subr.mxu0 %v324_v30  ;;  %v417_v47 = vld [vmem:[%s1803_s3 + $0x18] sm:$0xff]  ;;  %v304_v48 = vld [vmem:[%s1801_s1 + $0x30] sm:$0xff]  ;;  %v415_v51 = vld [vmem:[%s1803_s3 + $0x8] sm:$0xff] }
  0x21   : > { %506 = vmatprep.subr.mxu1 %v429_v23  ;;  %996 = vmatpush3.msra.mxu0 %v308_v32  ;;  %v416_v49 = vld [vmem:[%s1803_s3 + $0x10] sm:$0xff]  ;;  %v303_v52 = vld [vmem:[%s1801_s1 + $0x28] sm:$0xff]  ;;  %v414_v53 = vld [vmem:[%s1803_s3] sm:$0xff] }
  0x22   : > { %507 = vmatpush1.msra.mxu1 %v428_v25  ;;  %997 = vmatprep.subr.mxu0 %v323_v34  ;;  %v318_v54 = vld [vmem:[%s1801_s1 + $0xa0] sm:$0xff]  ;;  %v477_v55 = vld [vmem:[%s1803_s3 + $0x1f8] sm:$0xff]  ;;  %v476_v57 = vld [vmem:[%s1803_s3 + $0x1f0] sm:$0xff] }
  0x23   : > { %508 = vmatprep.subr.mxu1 %v427_v27  ;;  %998 = vmatpush3.msra.mxu0 %v307_v36  ;;  %v302_v56 = vld [vmem:[%s1801_s1 + $0x20] sm:$0xff]  ;;  %v317_v58 = vld [vmem:[%s1801_s1 + $0x98] sm:$0xff]  ;;  %v475_v59 = vld [vmem:[%s1803_s3 + $0x1e8] sm:$0xff] }
  0x24   : > { %509 = vmatpush1.msra.mxu1 %v426_v29  ;;  %999 = vmatprep.subr.mxu0 %v322_v38  ;;  %v301_v60 = vld [vmem:[%s1801_s1 + $0x18] sm:$0xff]  ;;  %v474_v61 = vld [vmem:[%s1803_s3 + $0x1e0] sm:$0xff]  ;;  %v316_v62 = vld [vmem:[%s1801_s1 + $0x90] sm:$0xff] }
  0x25   : > { %510 = vmatprep.subr.mxu1 %v425_v31  ;;  %1000 = vmatpush3.msra.mxu0 %v306_v40  ;;  %v473_v63 = vld [vmem:[%s1803_s3 + $0x1d8] sm:$0xff]  ;;  %v300_v0 = vld [vmem:[%s1801_s1 + $0x10] sm:$0xff]  ;;  %v315_v2 = vld [vmem:[%s1801_s1 + $0x88] sm:$0xff] }
  0x26   : > { %511 = vmatpush1.msra.mxu1 %v424_v33  ;;  %1001 = vmatprep.subr.mxu0 %v321_v42  ;;  %v472_v1 = vld [vmem:[%s1803_s3 + $0x1d0] sm:$0xff]  ;;  %v471_v3 = vld [vmem:[%s1803_s3 + $0x1c8] sm:$0xff]  ;;  %v470_v5 = vld [vmem:[%s1803_s3 + $0x1c0] sm:$0xff] }
  0x27   : > { %512 = vmatprep.subr.mxu1 %v423_v35  ;;  %1002 = vmatpush3.msra.mxu0 %v305_v44  ;;  %v299_v4 = vld [vmem:[%s1801_s1 + $0x8] sm:$0xff]  ;;  %v314_v6 = vld [vmem:[%s1801_s1 + $0x80] sm:$0xff]  ;;  %v469_v7 = vld [vmem:[%s1803_s3 + $0x1b8] sm:$0xff] }
  0x28   : > { %513 = vmatpush1.msra.mxu1 %v422_v37  ;;  %1003 = vmatprep.subr.mxu0 %v320_v46  ;;  %v298_v8 = vld [vmem:[%s1801_s1] sm:$0xff]  ;;  %v468_v9 = vld [vmem:[%s1803_s3 + $0x1b0] sm:$0xff]  ;;  %v295_v10 = vld [vmem:[%s276_s8 + $0x8] sm:$0xff] }
  0x29   : > { %514 = vmatprep.subr.mxu1 %v421_v39  ;;  %1004 = vmatpush3.msra.mxu0 %v304_v48  ;;  %v467_v11 = vld [vmem:[%s1803_s3 + $0x1a8] sm:$0xff]  ;;  %v294_v12 = vld [vmem:[%s276_s8] sm:$0xff]  ;;  %v297_v14 = vld [vmem:[%s276_s8 + $0x18] sm:$0xff] }
  0x2a   : > { %515 = vmatpush1.msra.mxu1 %v420_v41  ;;  %1005 = vmatprep.subr.mxu0 %v319_v50  ;;  %v466_v13 = vld [vmem:[%s1803_s3 + $0x1a0] sm:$0xff]  ;;  %v465_v15 = vld [vmem:[%s1803_s3 + $0x198] sm:$0xff]  ;;  %v464_v16 = vld [vmem:[%s1803_s3 + $0x190] sm:$0xff] }
  0x2b   : > { %516 = vmatprep.subr.mxu1 %v419_v43  ;;  %1006 = vmatpush3.msra.mxu0 %v303_v52  ;;  %v463_v17 = vld [vmem:[%s1803_s3 + $0x188] sm:$0xff]  ;;  %v296_v18 = vld [vmem:[%s276_s8 + $0x10] sm:$0xff]  ;;  %v462_v19 = vld [vmem:[%s1803_s3 + $0x180] sm:$0xff]  ;;  %v480_v43 = vlaneseq  ;;  %s1703_s8 = scalar_lea.vmem [#allocation3], %s937_s10  }
  0x2c   : > { %517 = vmatpush1.msra.mxu1 %v418_v45  ;;  %1007 = vmatprep.subr.mxu0 %v318_v54  ;;  %v461_v20 = vld [vmem:[%s1803_s3 + $0x178] sm:$0xff]  ;;  %v460_v21 = vld [vmem:[%s1803_s3 + $0x170] sm:$0xff]  ;;  %v459_v22 = vld [vmem:[%s1803_s3 + $0x168] sm:$0xff] }
  0x2d   : > { %518 = vmatprep.subr.mxu1 %v417_v47  ;;  %1008 = vmatpush3.msra.mxu0 %v302_v56  ;;  %v458_v23 = vld [vmem:[%s1803_s3 + $0x160] sm:$0xff]  ;;  %v457_v24 = vld [vmem:[%s1803_s3 + $0x158] sm:$0xff]  ;;  %v456_v25 = vld [vmem:[%s1803_s3 + $0x150] sm:$0xff]  ;;  %v481_v46 = vshrl.u32 %v480_v43, 7 }
  0x2e   : > { %519 = vmatpush1.msra.mxu1 %v416_v49  ;;  %1009 = vmatprep.subr.mxu0 %v317_v58  ;;  %v455_v26 = vld [vmem:[%s1803_s3 + $0x148] sm:$0xff]  ;;  %v454_v27 = vld [vmem:[%s1803_s3 + $0x140] sm:$0xff]  ;;  %v453_v28 = vld [vmem:[%s1803_s3 + $0x138] sm:$0xff] }
  0x2f   : > { %520 = vmatprep.subr.mxu1 %v415_v51  ;;  %1010 = vmatpush3.msra.mxu0 %v301_v60  ;;  %v452_v29 = vld [vmem:[%s1803_s3 + $0x130] sm:$0xff]  ;;  %v451_v30 = vld [vmem:[%s1803_s3 + $0x128] sm:$0xff]  ;;  %v450_v31 = vld [vmem:[%s1803_s3 + $0x120] sm:$0xff]  ;;  %v482_v47 = vsub.s32 0, %v481_v46  ;;  %v486_v49 = vsub.s32 1, %v481_v46 }
  0x30   : > { %521 = vmatpush1.msra.mxu1 %v414_v53  ;;  %1011 = vmatprep.subr.mxu0 %v316_v62  ;;  %v449_v32 = vld [vmem:[%s1803_s3 + $0x118] sm:$0xff]  ;;  %v448_v33 = vld [vmem:[%s1803_s3 + $0x110] sm:$0xff]  ;;  %v447_v34 = vld [vmem:[%s1803_s3 + $0x108] sm:$0xff] }
  0x31   : > { %522 = vmatprep.subr.mxu1 %v477_v55  ;;  %1012 = vmatpush3.msra.mxu0 %v300_v0  ;;  %v446_v35 = vld [vmem:[%s1803_s3 + $0x100] sm:$0xff] }
  0x32   : > { %523 = vmatpush2.msra.mxu1 %v476_v57  ;;  %1013 = vmatprep.subr.mxu0 %v315_v2  ;;  %v941_v37 = vld [vmem:[%s1802_s2] ss:$0 sm:$0xff] }
  0x33   : > { %524 = vmatprep.subr.mxu1 %v475_v59  ;;  %1014 = vmatpush3.msra.mxu0 %v299_v4  ;;  %v478_v48 = vld [vmem:[%s1804_s4] sm:$0x3] }
  0x34   : > { %525 = vmatpush2.msra.mxu1 %v474_v61  ;;  %1015 = vmatprep.subr.mxu0 %v314_v6  ;;  %v483_v50 = vrot.slane %v478_v48, %v482_v47  ;;  %v487_v51 = vrot.slane %v478_v48, %v486_v49 }
  0x35   : > { %526 = vmatprep.subr.mxu1 %v473_v63  ;;  %1016 = vmatpush3.msra.mxu0 %v298_v8 }
  0x36   : > { %527 = vmatpush2.msra.mxu1 %v472_v1  ;;  %401 = vmatprep.mubr.f32.mxu0 %v295_v10 }
  0x37   : > { %528 = vmatprep.subr.mxu1 %v471_v3  ;;  %402 = vmatmul.mubr.f32.vlgmr.msra.gmra.mxu0 %v294_v12 }
  0x38   : > { %529 = vmatpush2.msra.mxu1 %v470_v5  ;;  %406 = vmatprep.mubr.f32.mxu0 %v297_v14 }
  0x39   : > { %530 = vmatprep.subr.mxu1 %v469_v7  ;;  %554 = vmatprep.mubr.f32.mxu1 %v295_v10 }
  0x3a   : > { %531 = vmatpush2.msra.mxu1 %v468_v9 }
  0x3b   : > { %532 = vmatprep.subr.mxu1 %v467_v11  ;;  %407 = vmatmul.mubr.f32.gmra.mxu0 %v296_v18 }
  0x3c   : > { %533 = vmatpush2.msra.mxu1 %v466_v13 }
  0x3d   : > { %534 = vmatprep.subr.mxu1 %v465_v15 }
  0x3e   : > { %535 = vmatpush2.msra.mxu1 %v464_v16 }
  0x3f   : > { %536 = vmatprep.subr.mxu1 %v463_v17 }
  0x40   : > { %537 = vmatpush2.msra.mxu1 %v462_v19 }
  0x41   : > { %538 = vmatprep.subr.mxu1 %v461_v20 }
  0x42   : > { %539 = vmatpush2.msra.mxu1 %v460_v21 }
  0x43   : > { %540 = vmatprep.subr.mxu1 %v459_v22 }
  0x44   : > { %541 = vmatpush2.msra.mxu1 %v458_v23 }
  0x45   : > { %542 = vmatprep.subr.mxu1 %v457_v24 }
  0x46   : > { %543 = vmatpush2.msra.mxu1 %v456_v25 }
  0x47   : > { %544 = vmatprep.subr.mxu1 %v455_v26 }
  0x48   : > { %545 = vmatpush2.msra.mxu1 %v454_v27 }
  0x49   : > { %546 = vmatprep.subr.mxu1 %v453_v28 }
  0x4a   : > { %547 = vmatpush2.msra.mxu1 %v452_v29 }
  0x4b   : > { %548 = vmatprep.subr.mxu1 %v451_v30 }
  0x4c   : > { %549 = vmatpush2.msra.mxu1 %v450_v31 }
  0x4d   : > { %550 = vmatprep.subr.mxu1 %v449_v32 }
  0x4e   : > { %551 = vmatpush2.msra.mxu1 %v448_v33 }
  0x4f   : > { %552 = vmatprep.subr.mxu1 %v447_v34 }
  0x50   : > { %553 = vmatpush2.msra.mxu1 %v446_v35 }
  0x51   : > { %555 = vmatmul.mubr.f32.vlgmr.msra.gmra.mxu1 %v294_v12 }
  0x52   : > { %560 = vmatprep.mubr.f32.mxu1 %v297_v14 }
  0x55   : > { %561 = vmatmul.mubr.f32.gmra.mxu1 %v296_v18 }
  0xf7   : > { %v1017_v36 = vpop.f32.mrf.mxu0 }
  0xf9   : > { %v1018_v38 = vpop.f32.mrf.mxu0 }
  0xfa   : > { %v1019_v39 = vadd.f32 %v1018_v38, %v1017_v36 }
  0xfb   : > { %v1020_v40 = vpop.f32.mrf.mxu0 }
  0xfc   : > { %v404_v41 = vadd.f32 %v1019_v39, %v941_v37 }
  0xfd   : > { %v1021_v42 = vpop.f32.mrf.mxu0 }
  0xfe   : > { %412 = vst [vmem:[%s1696_s11] sm:$0xff] %v404_v41  ;;  %v1022_v44 = vadd.f32 %v1021_v42, %v1020_v40 }
 0x100   : > { %v409_v45 = vadd.f32 %v1022_v44, %v941_v37 }
 0x102   : > { %413 = vst [vmem:[%s1696_s11 + $0x8] sm:$0xff] %v409_v45 }
 0x111   : > { %v556_v52 = vpop.f32.mrf.mxu1 }
 0x112   : > { %v557_v53 = vadd.f32 %v556_v52, %v483_v50 }
 0x113   : > { %v558_v54 = vpop.f32.mrf.mxu1 }
 0x114   : > { %567 = vst [vmem:[%s1703_s8] sm:$0xff] %v557_v53  ;;  %v559_v55 = vadd.f32 %v558_v54, %v487_v51 }
 0x115   : > { %v562_v56 = vpop.f32.mrf.mxu1 }
 0x116   : > { %568 = vst [vmem:[%s1703_s8 + $0x8] sm:$0xff] %v559_v55  ;;  %v563_v57 = vadd.f32 %v562_v56, %v483_v50  ;;  %581 = sbr.rel (!%p1387_p4) target bundleno = 322 (0x142), region = 44 }
 0x117   : > { %v564_v58 = vpop.f32.mrf.mxu1 }
 0x118   : > { %569 = vst [vmem:[%s1703_s8 + $0x10] sm:$0xff] %v563_v57  ;;  %v565_v59 = vadd.f32 %v564_v58, %v487_v51 }
 0x11a   : > { %570 = vst [vmem:[%s1703_s8 + $0x18] sm:$0xff] %v565_v59 }
 0x11b   : > { %s1815_s23 = smov (!%p584_p8, %s583_s23), 2 }
 0x11c   : > { %s945_s9 = sshll.u32 %s1815_s23, 7 }
 0x11d   : > { %p948_p9 = scmp.eq.s32.totalorder %s945_s9, 0 }
 0x11e   : > { %s1722_s12 = sshrl.u32 (!%p948_p9), %s1815_s23, 1 }
 0x11f   : > { %592 = sbr.rel (%p948_p9) target bundleno = 322 (0x142), region = 48  ;;  %p949_p10 = scmp.le.s32.totalorder (!%p948_p9), %s1722_s12, 0 }
 0x124   : > { %851 = sbr.rel (%p949_p10) target bundleno = 305 (0x131), region = 168  ;;  %s1263_s13 = smov (!%p949_p10), %s1716_s7  }
 0x125   : > { %s1267_s14 = smov (!%p949_p10), %s1696_s11   ;;  %s1271_s15 = smov (!%p949_p10), 0  }
 0x126   : > { %s1275_s17 = smov (!%p949_p10), 0  }
 0x129 LB: >> { %v657_v60 = vld [vmem:[%s1269_s14] sm:$0xff]  ;;  %v659_v61 = vld [vmem:[%s1269_s14 + $0x8] sm:$0xff]  ;;  %s661_s18 = sadd.s32 1, %s1273_s15  ;;  %s651_s17 = sadd.s32 1, %s1277_s17   ;;  %s1277_s17 = sphi %s1275_s17, %s651_s17   ;;  %s1273_s15 = sphi %s1271_s15, %s1272_s15   ;;  %s1269_s14 = sphi %s1267_s14, %s666_s14   ;;  %s1265_s13 = sphi %s1263_s13, %s667_s13  }
 0x12a   : >> { %658 = vst [vmem:[%s1265_s13] sm:$0xff] %v657_v60  ;;  %660 = vst [vmem:[%s1265_s13 + $0x8] sm:$0xff] %v659_v61  ;;  %p662_p11 = scmp.ge.s32.totalorder %s661_s18, %s1722_s12  ;;  %p650_p12 = scmp.ge.s32.totalorder %s651_s17, %s1722_s12 }
 0x12c   : >> { %s1817_s18 = smov (%p662_p11, %s661_s18), 0  ;;  %653 = sbr.rel (!%p650_p12) target bundleno = 297 (0x129), region = 174 }
 0x12d   : >> { %s950_s19 = sshll.u32 %s1817_s18, 4  ;;  %s1272_s15 = smov %s1817_s18  }
 0x12e   : >> { %s666_s14 = scalar_lea.vmem %s1696_s11, %s950_s19 [#allocation2]   ;;  %s667_s13 = scalar_lea.vmem %s1716_s7, %s950_s19  }
 0x131 PF: > { %s1732_s21 = sand.u32 1, %s1815_s23   ;;  %s978_s20 = sshll.u32 %s1722_s12, 4 }
 0x132   : > { %s672_s10 = scalar_lea.vmem %s1696_s11, %s978_s20 [#allocation2]   ;;  %s674_s26 = scalar_lea.vmem %s1716_s7, %s978_s20  }
 0x133   : > { %p955_p13 = scmp.le.s32.totalorder %s1732_s21, 0 }
 0x134   : > { %s1279_s27 = smov (!%p955_p13), %s674_s26   ;;  %s1283_s30 = smov (!%p955_p13), %s672_s10  }
 0x135   : > { %865 = sbr.rel (%p955_p13) target bundleno = 322 (0x142), region = 179  ;;  %s1287_s9 = smov (!%p955_p13), 0  }
 0x136   : > { %s1291_s13 = smov (!%p955_p13), 0  }
 0x13a LB: >> { %v684_v62 = vld [vmem:[%s1285_s30] sm:$0xff]  ;;  %s686_s23 = sadd.s32 1, %s1289_s9  ;;  %s678_s13 = sadd.s32 1, %s1293_s13   ;;  %s1293_s13 = sphi %s1291_s13, %s678_s13   ;;  %s1289_s9 = sphi %s1287_s9, %s1288_s9   ;;  %s1285_s30 = sphi %s1283_s30, %s691_s30   ;;  %s1281_s27 = sphi %s1279_s27, %s692_s27  }
 0x13b   : >> { %685 = vst [vmem:[%s1281_s27] sm:$0xff] %v684_v62  ;;  %p687_p0 = scmp.ge.s32.totalorder %s686_s23, %s1732_s21  ;;  %p677_p1 = scmp.ge.s32.totalorder %s678_s13, %s1732_s21 }
 0x13d   : >> { %s1819_s23 = smov (%p687_p0, %s686_s23), 0  ;;  %680 = sbr.rel (!%p677_p1) target bundleno = 314 (0x13a), region = 185 }
 0x13e   : >> { %s956_s11 = sshll.u32 %s1819_s23, 3  ;;  %s1288_s9 = smov %s1819_s23  }
 0x13f   : >> { %s691_s30 = scalar_lea.vmem %s672_s10, %s956_s11 [#allocation2]   ;;  %s692_s27 = scalar_lea.vmem %s674_s26, %s956_s11  }
 0x142 PF: > { %698 = sbr.rel (!%p1387_p4) target bundleno = 366 (0x16e), region = 96  ;;  %s700_s7 = ssub.s32 (%p1387_p4), 3, %s1515_s16 }
 0x143   : > { %s982_s12 = sshll.u32 (%p1387_p4), %s1375_s24, 5  ;;  %p701_p2 = scmp.lt.s32.totalorder (%p1387_p4), %s700_s7, 2 }
 0x144   : > { %s1747_s17 = scalar_lea.vmem (%p1387_p4), %s1806_s6, %s982_s12  }
 0x147   : > { %s1821_s7 = smov (!%p701_p2, %s700_s7), 2 }
 0x148   : > { %s980_s18 = sshll.u32 %s1821_s7, 8 }
 0x149   : > { %p964_p3 = scmp.eq.s32.totalorder %s980_s18, 0 }
 0x14a   : > { %s1753_s19 = sshrl.u32 (!%p964_p3), %s1821_s7, 1 }
 0x14b   : > { %711 = sbr.rel (%p964_p3) target bundleno = 366 (0x16e), region = 100  ;;  %p965_p4 = scmp.le.s32.totalorder (!%p964_p3), %s1753_s19, 0 }
 0x150   : > { %879 = sbr.rel (%p965_p4) target bundleno = 349 (0x15d), region = 190  ;;  %s1808_s24 = smov (!%p965_p4), %s1747_s17 }
 0x151   : > { %s1809_s29 = smov (!%p965_p4), %s1703_s8  ;;  %s1762_s16 = smov (!%p965_p4), 0  }
 0x152   : > { %s1307_s21 = smov (!%p965_p4), 0  }
 0x155 LB: >> { %v724_v63 = vld [vmem:[%s1301_s29] sm:$0xff]  ;;  %v726_v0 = vld [vmem:[%s1301_s29 + $0x10] sm:$0xff]  ;;  %v728_v1 = vld [vmem:[%s1301_s29 + $0x8] sm:$0xff]  ;;  %s732_s20 = sadd.s32 1, %s1305_s16  ;;  %s718_s21 = sadd.s32 1, %s1309_s21   ;;  %s1309_s21 = sphi %s1307_s21, %s718_s21   ;;  %s1305_s16 = sphi %s1762_s16, %s1810_s16   ;;  %s1301_s29 = sphi %s1809_s29, %s737_s29   ;;  %s1297_s24 = sphi %s1808_s24, %s738_s24  }
 0x156   : >> { %725 = vst [vmem:[%s1297_s24] sm:$0xff] %v724_v63  ;;  %727 = vst [vmem:[%s1297_s24 + $0x10] sm:$0xff] %v726_v0  ;;  %v730_v2 = vld [vmem:[%s1301_s29 + $0x18] sm:$0xff]  ;;  %p733_p5 = scmp.ge.s32.totalorder %s732_s20, %s1753_s19  ;;  %p717_p6 = scmp.ge.s32.totalorder %s718_s21, %s1753_s19 }
 0x157   : >> { %729 = vst [vmem:[%s1297_s24 + $0x8] sm:$0xff] %v728_v1  ;;  %731 = vst [vmem:[%s1297_s24 + $0x18] sm:$0xff] %v730_v2 }
 0x158   : >> { %s1823_s20 = smov (%p733_p5, %s732_s20), 0  ;;  %720 = sbr.rel (!%p717_p6) target bundleno = 341 (0x155), region = 196 }
 0x159   : >> { %s966_s10 = sshll.u32 %s1823_s20, 5  ;;  %s1810_s16 = smov %s1823_s20 }
 0x15a   : >> { %s737_s29 = scalar_lea.vmem %s1703_s8, %s966_s10 [#allocation3]   ;;  %s738_s24 = scalar_lea.vmem %s1747_s17, %s966_s10  }
 0x15d PF: > { %s1778_s26 = sand.u32 1, %s1821_s7   ;;  %s983_s27 = sshll.u32 %s1753_s19, 5 }
 0x15e   : > { %s1782_s30 = scalar_lea.vmem %s1703_s8, %s983_s27 [#allocation3]   ;;  %s745_s9 = scalar_lea.vmem %s1747_s17, %s983_s27  }
 0x15f   : > { %p971_p7 = scmp.le.s32.totalorder %s1778_s26, 0 }
 0x160   : > { %s1311_s13 = smov (!%p971_p7), %s745_s9   ;;  %s1315_s23 = smov (!%p971_p7), %s1782_s30  }
 0x161   : > { %893 = sbr.rel (%p971_p7) target bundleno = 366 (0x16e), region = 201  ;;  %s1319_s11 = smov (!%p971_p7), 0  }
 0x162   : > { %s1323_s12 = smov (!%p971_p7), 0  }
 0x166 LB: >> { %v755_v3 = vld [vmem:[%s1317_s23] sm:$0xff]  ;;  %v757_v4 = vld [vmem:[%s1317_s23 + $0x8] sm:$0xff]  ;;  %s759_s8 = sadd.s32 1, %s1321_s11  ;;  %s749_s12 = sadd.s32 1, %s1325_s12   ;;  %s1325_s12 = sphi %s1323_s12, %s749_s12   ;;  %s1321_s11 = sphi %s1319_s11, %s1320_s11   ;;  %s1317_s23 = sphi %s1315_s23, %s764_s23   ;;  %s1313_s13 = sphi %s1311_s13, %s765_s13  }
 0x167   : >> { %756 = vst [vmem:[%s1313_s13] sm:$0xff] %v755_v3  ;;  %758 = vst [vmem:[%s1313_s13 + $0x8] sm:$0xff] %v757_v4  ;;  %p760_p8 = scmp.ge.s32.totalorder %s759_s8, %s1778_s26  ;;  %p748_p9 = scmp.ge.s32.totalorder %s749_s12, %s1778_s26 }
 0x169   : >> { %s1825_s8 = smov (%p760_p8, %s759_s8), 0  ;;  %751 = sbr.rel (!%p748_p9) target bundleno = 358 (0x166), region = 207 }
 0x16a   : >> { %s972_s7 = sshll.u32 %s1825_s8, 4  ;;  %s1320_s11 = smov %s1825_s8  }
 0x16b   : >> { %s764_s23 = scalar_lea.vmem %s1782_s30, %s972_s7 [#allocation3]   ;;  %s765_s13 = scalar_lea.vmem %s745_s9, %s972_s7  }
 0x16e PF: > { %p14_p10 = scmp.ge.s32.totalorder %s1377_s25, 4   ;;  %s1811_s21 = smov %s1257_s22 }
 0x16f   : > { %s1812_s22 = smov %s1385_s28  ;;  %s1813_s23 = smov %s1377_s25 }
 0x170   :  { %16 = sbr.rel (!%p14_p10) target bundleno = 2 (0x2), region = 218 }

</bundles_post_ra>
